<compile_context>
chip_gen: v5e
topology: v5e:2x2
jax: 0.10.0
libtpu: 0.0.40
codegen_flags: <defaults>
</compile_context>

<pallas_src>
import functools
import math

import jax
import jax.numpy as jnp
from jax import lax
from jax.experimental import pallas as pl
from jax.experimental.pallas import tpu as pltpu


_VMEM_LIMIT_BYTES = 48 * 1024 * 1024  # leaves headroom inside v7x's 64 MiB/TC


def _pick_tile(n, cap, prefer_split=False):
    """Largest multiple-of-8 divisor of n that is <= cap.

    With prefer_split (used for the 'parallel' query axis) the tile is also
    capped near n//2 so there are >= 2 grid steps and both v7x TensorCores get
    work.  Falls back to the full extent n (a full-array block is always a
    legal block shape), which also avoids any divisibility assert vs. cdiv.
    """
    limit = min(cap, n)
    if prefer_split and n > 8:
        limit = min(limit, max(8, n // 2))
    best = None
    t = 8
    while t <= limit:
        if n % t == 0:
            best = t
        t += 8
    return best if best is not None else n


# --------------------------------------------------------------------------
# Phase 1: hoisted projections (computed once, NOT per query tile).
# --------------------------------------------------------------------------
def _linear_kernel(x_ref, w_ref, o_ref):
    # bf16 MXU operands, f32 accumulation, bf16 output (consumed by the MXU
    # again in the attention kernel; halves resident VMEM).
    o_ref[...] = jnp.dot(x_ref[...].astype(jnp.bfloat16), w_ref[...],
                         preferred_element_type=jnp.float32).astype(o_ref.dtype)


def _project(x, w):
    """y = x @ w (w already bf16, head-stacked).  Row-tiled, 'parallel' grid."""
    R, dmodel = x.shape
    N = w.shape[-1]
    tile_r = _pick_tile(R, cap=512, prefer_split=True)
    cost = pl.CostEstimate(
        flops=2 * R * dmodel * N,
        transcendentals=0,
        bytes_accessed=R * dmodel * x.dtype.itemsize + dmodel * N * 2 + R * N * 2)
    return pl.pallas_call(
        _linear_kernel,
        out_shape=jax.ShapeDtypeStruct((R, N), jnp.bfloat16),
        grid_spec=pltpu.PrefetchScalarGridSpec(
            num_scalar_prefetch=0,
            grid=(R // tile_r,),
            in_specs=[pl.BlockSpec((tile_r, dmodel), lambda i: (i, 0)),
                      pl.BlockSpec((dmodel, N), lambda i: (0, 0))],
            out_specs=pl.BlockSpec((tile_r, N), lambda i: (i, 0))),
        compiler_params=pltpu.CompilerParams(
            dimension_semantics=("parallel",),
            vmem_limit_bytes=_VMEM_LIMIT_BYTES),
        cost_estimate=cost,
    )(x, w)


# --------------------------------------------------------------------------
# Phase 2: flash-style attention + fused output projection.
# --------------------------------------------------------------------------
def _attn_kernel(qp_ref, kp_ref, vp_ref, wl_ref, o_ref,
                 m_sc, l_sc, acc_sc, *, num_heads, dk, dv):
    j = pl.program_id(1)

    @pl.when(j == 0)
    def _init():
        m_sc[...] = jnp.full(m_sc.shape, -jnp.inf, m_sc.dtype)
        l_sc[...] = jnp.zeros(l_sc.shape, l_sc.dtype)
        acc_sc[...] = jnp.zeros(acc_sc.shape, acc_sc.dtype)

    # Online-softmax update per head; H is small and static, so this unrolls.
    for h in range(num_heads):
        qh = qp_ref[:, h * dk:(h + 1) * dk]               # bf16 [tq,  dk]
        kh = kp_ref[:, h * dk:(h + 1) * dk]               # bf16 [tkv, dk]
        vh = vp_ref[:, h * dv:(h + 1) * dv]               # bf16 [tkv, dv]

        # scores = qh @ kh^T (1/sqrt(dk) pre-folded into Wq), f32 accumulate,
        # no explicit transpose (contract last dims on the MXU).
        s = lax.dot_general(qh, kh,
                            dimension_numbers=(((1,), (1,)), ((), ())),
                            preferred_element_type=jnp.float32)   # [tq, tkv]

        m_prev = m_sc[:, h:h + 1]
        l_prev = l_sc[:, h:h + 1]
        a_prev = acc_sc[:, h * dv:(h + 1) * dv]

        m_new = jnp.maximum(m_prev, jnp.max(s, axis=-1, keepdims=True))
        alpha = jnp.exp(m_prev - m_new)
        # Softmax math stays f32 (v5e has no bf16 VPU/EUP path); cast to bf16
        # only at the MXU operand boundary below.
        p = jnp.exp(s - m_new)
        l_sc[:, h:h + 1] = alpha * l_prev + jnp.sum(p, axis=-1, keepdims=True)
        acc_sc[:, h * dv:(h + 1) * dv] = alpha * a_prev + jnp.dot(
            p.astype(jnp.bfloat16), vh, preferred_element_type=jnp.float32)
        m_sc[:, h:h + 1] = m_new

    @pl.when(j == pl.num_programs(1) - 1)
    def _finalize():
        # Normalize each head by its softmax denominator (EUP approx recip),
        # then a single lane-dense bf16 output matmul into the padded output.
        for h in range(num_heads):
            inv = pl.reciprocal(l_sc[:, h:h + 1], approx=True)
            acc_sc[:, h * dv:(h + 1) * dv] = acc_sc[:, h * dv:(h + 1) * dv] * inv
        head_cat = acc_sc[...].astype(jnp.bfloat16)        # [tq, H*dv]
        o_ref[...] = jnp.dot(head_cat, wl_ref[...],
                             preferred_element_type=jnp.float32
                             ).astype(o_ref.dtype)


def prepare_weights(wq, wk, wv, wlast):
    """One-time weight prep (do NOT call per forward).

    wq/wk: [H, dmodel, dk], wv: [H, dmodel, dv] in x@W layout (transpose of
    nn.Linear.weight per head); wlast: [dout, H*dv] (nn.Linear.weight layout).

    Returns (wq_flat, wk_flat, wv_flat, wlast_t_padded, dout):
      * head-major column-stacked [dmodel, H*dk] / [dmodel, H*dv] weights,
      * 1/sqrt(dk) folded into Wq in f32 BEFORE the bf16 cast,
      * W_out^T zero-padded on its output axis to a multiple of 128 so the
        kernel output store is lane-dense,
      * all weights cast to bf16 last (native MXU operands).
    """
    H, dmodel, dk = wq.shape
    dv = wv.shape[-1]
    scale = 1.0 / math.sqrt(float(dk))
    wq_flat = (jnp.transpose(wq, (1, 0, 2)) * scale).reshape(dmodel, H * dk)
    wk_flat = jnp.transpose(wk, (1, 0, 2)).reshape(dmodel, H * dk)
    wv_flat = jnp.transpose(wv, (1, 0, 2)).reshape(dmodel, H * dv)
    dout = wlast.shape[0]
    dout_p = ((dout + 127) // 128) * 128
    wlast_t = wlast.T                                      # [H*dv, dout]
    if dout_p != dout:
        wlast_t = jnp.pad(wlast_t, ((0, 0), (0, dout_p - dout)))
    cast = lambda a: a.astype(jnp.bfloat16)
    return cast(wq_flat), cast(wk_flat), cast(wv_flat), cast(wlast_t), dout


def multi_head_attention(q, k, v, wq_flat, wk_flat, wv_flat, wlast_t, dout,
                         *, num_heads, dk, dv, tile_q=None, tile_kv=None):
    """q: [S, dmodel], k/v: [Skv, dmodel] (f32); flat bf16 weights from
    prepare_weights().  Returns [S, dout] in q.dtype."""
    S, dmodel = q.shape
    Skv = k.shape[0]
    dout_p = wlast_t.shape[-1]

    # ---- Phase 1: projections, each computed exactly once (hoisted). ----
    qp = _project(q, wq_flat)          # [S,   H*dk] bf16, scale pre-folded
    kp = _project(k, wk_flat)          # [Skv, H*dk] bf16
    vp = _project(v, wv_flat)          # [Skv, H*dv] bf16

    # ---- Phase 2: attention + output projection. ----
    if tile_q is None:
        # Cap so (q tile + f32 scratch + double-buffered KV tiles + weights)
        # stays well inside v7x's 64 MiB/TC, and so S splits into >= 2 steps.
        tile_q = _pick_tile(S, cap=256, prefer_split=True)
    if tile_kv is None:
        tile_kv = _pick_tile(Skv, cap=512)
    grid = (S // tile_q, Skv // tile_kv)

    kernel = functools.partial(_attn_kernel, num_heads=num_heads, dk=dk, dv=dv)

    cost = pl.CostEstimate(
        flops=(2 * S * Skv * num_heads * (dk + dv)
               + 2 * S * (num_heads * dv) * dout_p),
        transcendentals=S * Skv * num_heads + S * num_heads * grid[1],
        bytes_accessed=(qp.size * 2 + (kp.size + vp.size) * 2 * grid[0]
                        + wlast_t.size * 2 + S * dout_p * 4))

    grid_spec = pltpu.PrefetchScalarGridSpec(
        num_scalar_prefetch=0,
        grid=grid,
        in_specs=[
            pl.BlockSpec((tile_q, num_heads * dk), lambda i, j: (i, 0)),   # qp
            pl.BlockSpec((tile_kv, num_heads * dk), lambda i, j: (j, 0)),  # kp
            pl.BlockSpec((tile_kv, num_heads * dv), lambda i, j: (j, 0)),  # vp
            pl.BlockSpec(wlast_t.shape, lambda i, j: (0, 0)),              # W_out^T
        ],
        out_specs=pl.BlockSpec((tile_q, dout_p), lambda i, j: (i, 0)),
        scratch_shapes=[
            pltpu.VMEM((tile_q, num_heads), jnp.float32),       # running max m
            pltpu.VMEM((tile_q, num_heads), jnp.float32),       # running denom l
            pltpu.VMEM((tile_q, num_heads * dv), jnp.float32),  # un-normalized P@V
        ])

    out_p = pl.pallas_call(
        kernel,
        out_shape=jax.ShapeDtypeStruct((S, dout_p), q.dtype),
        grid_spec=grid_spec,
        compiler_params=pltpu.CompilerParams(
            dimension_semantics=("parallel", "arbitrary"),
            vmem_limit_bytes=_VMEM_LIMIT_BYTES),
        cost_estimate=cost,
    )(qp, kp, vp, wlast_t)

    return out_p[:, :dout] if dout_p != dout else out_p


def _reference(q, k, v, wq, wk, wv, wlast):
    """Plain-JAX f32 reference matching the PyTorch module."""
    H, _, dk = wq.shape
    heads = []
    for h in range(H):
        qh = q @ wq[h]
        kh = k @ wk[h]
        vh = v @ wv[h]
        s = (qh @ kh.T) / math.sqrt(float(dk))
        p = jax.nn.softmax(s, axis=-1)
        heads.append(p @ vh)
    head_cat = jnp.concatenate(heads, axis=-1)
    return head_cat @ wlast.T


if __name__ == "__main__":
    # Small, module-consistent shapes: dv == dk so the final Linear dims match.
    S, dmodel, dk, dv, H = 8, 32, 16, 16, 4

    key = jax.random.PRNGKey(0)
    kq, kk, kv_, kwq, kwk, kwv, kwl = jax.random.split(key, 7)

    q = jax.random.normal(kq, (S, dmodel), dtype=jnp.float32)
    k = jax.random.normal(kk, (S, dmodel), dtype=jnp.float32)
    v = jax.random.normal(kv_, (S, dmodel), dtype=jnp.float32)

    # Deterministic nn.Linear-like init (uniform in +-1/sqrt(fan_in)), bias=False.
    lim_in = 1.0 / math.sqrt(dmodel)
    wq = jax.random.uniform(kwq, (H, dmodel, dk), jnp.float32, -lim_in, lim_in)
    wk = jax.random.uniform(kwk, (H, dmodel, dk), jnp.float32, -lim_in, lim_in)
    wv = jax.random.uniform(kwv, (H, dmodel, dv), jnp.float32, -lim_in, lim_in)
    lim_out = 1.0 / math.sqrt(dk * H)
    wlast = jax.random.uniform(kwl, (dk * H, dk * H), jnp.float32,
                               -lim_out, lim_out)  # nn.Linear.weight layout

    # One-time weight preparation (outside the forward call).
    wq_flat, wk_flat, wv_flat, wlast_t, dout = prepare_weights(wq, wk, wv, wlast)

    out = multi_head_attention(q, k, v, wq_flat, wk_flat, wv_flat, wlast_t,
                               dout, num_heads=H, dk=dk, dv=dv)
    out = jax.block_until_ready(out)

    ref = _reference(q, k, v, wq, wk, wv, wlast)
    assert out.shape == (S, dk * H), out.shape
    # bf16 MXU operands -> compare against the f32 reference with a
    # bf16-appropriate tolerance.
    max_err = float(jnp.max(jnp.abs(out - ref)))
    assert jnp.allclose(out, ref, atol=5e-2, rtol=5e-2), f"mismatch, max_err={max_err}"

    print("KERNEL_OK")
</pallas_src>

<mosaic_0001>
module attributes {stable_mosaic.version = 11 : i64} {
  func.func @_linear_kernel(%arg0: i32, %arg1: memref<8x32xf32, #tpu.memory_space<vmem>>, %arg2: memref<32x64xbf16, #tpu.memory_space<vmem>>, %arg3: memref<8x64xbf16, #tpu.memory_space<vmem>>) attributes {dimension_semantics = [#tpu.dimension_semantics<parallel>], iteration_bounds = array<i64: 1>, scalar_prefetch = 0 : i64, scratch_operands = 0 : i64, tpu.core_type = #tpu.core_type<tc>, window_params = [{transform_indices = @transform_0, window_bounds = array<i64: 8, 32>}, {pipeline_mode = #tpu.pipeline_mode<synchronous>, transform_indices = @transform_1, window_bounds = array<i64: 32, 64>}, {transform_indices = @transform_2, window_bounds = array<i64: 8, 64>}]} {
    %c0 = arith.constant 0 : index
    %c0_0 = arith.constant 0 : index
    %0 = vector.load %arg1[%c0, %c0_0] : memref<8x32xf32, #tpu.memory_space<vmem>>, vector<8x32xf32>
    %1 = arith.truncf %0 : vector<8x32xf32> to vector<8x32xbf16>
    %c0_1 = arith.constant 0 : index
    %c0_2 = arith.constant 0 : index
    %2 = vector.load %arg2[%c0_1, %c0_2] : memref<32x64xbf16, #tpu.memory_space<vmem>>, vector<32x64xbf16>
    %cst = arith.constant dense<0.000000e+00> : vector<8x64xf32>
    %3 = tpu.matmul %1, %2, %cst {dimension_numbers = #tpu.dot_dimension_numbers<[1], [0], [0], [1], [0, 0, 1, 1], [], []>} : vector<8x32xbf16>, vector<32x64xbf16>, vector<8x64xf32> -> vector<8x64xf32>
    %4 = arith.truncf %3 : vector<8x64xf32> to vector<8x64xbf16>
    %c0_3 = arith.constant 0 : index
    %c0_4 = arith.constant 0 : index
    %5 = vector.load %arg3[%c0_3, %c0_4] : memref<8x64xbf16, #tpu.memory_space<vmem>>, vector<8x64xbf16>
    tpu.vector_store %arg3[%c0_3, %c0_4], %4 {strides = array<i32>} : memref<8x64xbf16, #tpu.memory_space<vmem>>, vector<8x64xbf16>,
    return
  }
  func.func @transform_0(%arg0: i32) -> (i32, i32) {
    %c0_i32 = arith.constant 0 : i32
    %c0_i32_0 = arith.constant 0 : i32
    return %arg0, %c0_i32 : i32, i32
  }
  func.func @transform_1(%arg0: i32) -> (i32, i32) {
    %c0_i32 = arith.constant 0 : i32
    %c0_i32_0 = arith.constant 0 : i32
    %c0_i32_1 = arith.constant 0 : i32
    return %c0_i32, %c0_i32_0 : i32, i32
  }
  func.func @transform_2(%arg0: i32) -> (i32, i32) {
    %c0_i32 = arith.constant 0 : i32
    %c0_i32_0 = arith.constant 0 : i32
    return %arg0, %c0_i32 : i32, i32
  }
}

</mosaic_0001>

<bundles_post_ra>
// kernel: tpu_custom_call.1
= control target key start
LH: loop header
LB: loop body
LE: loop exit
PB: predicated region body
PF: predicated region fallthrough
CT: control target
= control target key end

     0   :  { %7 = vsyncpa [#allocation3], 0  ;;  %s222_s0 = inlined_call_operand.hbm [shape: f32[8,32], index: 0, kind: input, shape index: {}]   ;;  %s223_s1 = inlined_call_operand.hbm [shape: bf16[32,64], index: 1, kind: input, shape index: {}]   ;;  %s224_s2 = inlined_call_operand.hbm [shape: bf16[8,64], index: 2, kind: output, shape index: {}]  }
   0x1   :  { %8 = vsyncpa [#allocation6], 0 }
   0x2   :  { %9 = vsyncpa [#allocation4], 0  ;;  %s15_s11 = sshll.u32 %s222_s0, 4  ;;  %s193_s12 = smov [#allocation2]   ;;  %s16_s11 = int_to_ptr.hbm [resolvable:$true] %s15_s11 }
   0x3   :  { %s17_s13 = sshll.u32 %s193_s12, 4  ;;  %s25_s16 = sshll.u32 %s223_s1, 4  ;;  %s18_s13 = int_to_ptr.vmem [resolvable:$true] %s17_s13  ;;  %s26_s16 = int_to_ptr.hbm [resolvable:$true] %s25_s16 }
   0x4   :  { %20 = dma.hbm_to_vmem [thread:$0]  %s16_s11, 128, %s18_s13, [#allocation3]  }
   0x5   :  { %s194_s17 = smov [#allocation5]   ;;  %s195_s19 = smov 64  }
   0x6   :  { %s27_s18 = sshll.u32 %s194_s17, 4  ;;  %s196_s20 = smov 4   ;;  %s28_s18 = int_to_ptr.vmem [resolvable:$true] %s27_s18 }
   0x7   :  { %33 = dma.hbm_to_vmem [thread:$0]  %s26_s16, 256, %s28_s18, [#allocation6], %s195_s19, %s195_s19, %s196_s20  }
   0x8   :  { %187 = dma.done.wait [#allocation3], 128  }
   0x9   :  { %188 = vsyncadd [#allocation3], 4294967168 }
   0xa   :  { %189 = dma.done.wait [#allocation6], 256  }
   0xb   :  { %190 = vsyncadd [#allocation6], 4294967040  ;;  %v109_v0 = vld [vmem:[#allocation5 + $0x8] sm:$0xff]  ;;  %v108_v1 = vld [vmem:[#allocation5] sm:$0xff]  ;;  %vm61_vm0 = vcmask 261120   ;;  %s197_s0 = smov [#allocation7]  }
   0xc   :  { %71 = vmatpush.bf16.msra.mxu0 %v109_v0  ;;  %v43_v2 = vld [vmem:[#allocation2] sm:$0xff]  ;;  %s86_s1 = sshll.u32 %s197_s0, 4  ;;  %s88_s23 = sshll.u32 %s224_s2, 4  ;;  %vm79_vm1 = vcmask 519168   ;;  %s87_s1 = int_to_ptr.vmem [resolvable:$true] %s86_s1  ;;  %s89_s23 = int_to_ptr.hbm [resolvable:$true] %s88_s23 }
   0xd   :  { %v44_v3 = vpack.c.bf16 %v43_v2, %v43_v2 }
  0x10   :  { %72 = vmatpush.bf16.msra.mxu0 %v108_v1 }
  0x13   :  { %107 = vmatmul.msk.bf16.vlgmr.msra.gmra.mxu0 %vm61_vm0, %v44_v3 }
  0x90   :  { %v74_v4 = vpop.f32.mrf.mxu0 }
  0x91   :  { %v78_v5 = vpack.c.bf16 %v74_v4, %v74_v4 }
  0x93   :  { %80 = vst.msk [vmem:[#allocation7] sm:$0xf] %vm79_vm1, %v78_v5 }
  0x94   :  { %91 = dma.vmem_to_hbm [thread:$0]  %s87_s1, 64, %s89_s23, [#allocation4]  }
  0x98   :  { %v76_v6 = vpop.f32.mrf.mxu0 }
  0x99   :  { %191 = dma.done.wait [#allocation4], 64  }
  0x9a   :  { %192 = vsyncadd [#allocation4], 4294967232 }
  0x9b   :  { %96 = vsyncpa [#allocation3], 1 }
  0x9c   :  { %97 = vsyncpa [#allocation6], 1 }
  0x9d   :  { %98 = vsyncpa [#allocation4], 1 }

</bundles_post_ra>
